<compile_context>
chip_gen: v6e
topology: v6e:2x2x1
jax: 0.10.0
libtpu: 0.0.40
codegen_flags: <defaults>
</compile_context>

<pallas_src>
import jax
import jax.numpy as jnp
from jax.experimental import pallas as pl
from jax.experimental.pallas import tpu as pltpu

# Module hyper-parameters (match the PyTorch defaults).
SENSOR_NUM = 7
ACTION_DIM = 7


def _sensor_action1_kernel(x_ref, w_ref, b_ref, o_ref):
    # x_ref: (BT, L*D)          lane-dense input tile
    # w_ref: (L*D, (S+1)*A)     fused weight, VMEM-resident across steps
    # b_ref: (1,   (S+1)*A)     tiled bias,   VMEM-resident across steps
    # o_ref: (BT,  (S+1)*A)     lane-dense output tile (one contiguous store)
    y = jnp.dot(x_ref[...], w_ref[...], preferred_element_type=jnp.float32)
    o_ref[...] = (y + b_ref[...].astype(jnp.float32)).astype(o_ref.dtype)


def _build_fused_weight(weight, bias, seq_len, sensor_num):
    """weight: (D, A), bias: (A,) -> Wfull: (L*D, (S+1)*A), bfull: (1, (S+1)*A).

    Output row r < S selects sequence position r (coef 1.0); the final output
    row is the mean over all L positions (coef 1/L).  The 1/L scaling lives in
    the fused weight, which is rebuilt here on every call from (weight, L).
    """
    D, A = weight.shape
    sel = jnp.eye(seq_len, sensor_num, dtype=jnp.float32)            # (L, S)
    pool = jnp.full((seq_len, 1), 1.0 / seq_len, dtype=jnp.float32)  # (L, 1)
    coef = jnp.concatenate([sel, pool], axis=1)                      # (L, S+1)
    # Wfull[l*D + d, r*A + a] = coef[l, r] * weight[d, a]   (a Kronecker product)
    w_full = jnp.einsum(
        "lr,da->ldra", coef, weight.astype(jnp.float32)
    ).reshape(seq_len * D, (sensor_num + 1) * A).astype(weight.dtype)
    b_full = jnp.tile(bias.reshape(1, A), (1, sensor_num + 1))       # (1, (S+1)*A)
    return w_full, b_full


def _pick_block_b(batch, bytes_per_batch):
    """Batch rows per grid step: ~8 MiB/tile, sublane-aligned, >=2 steps if B>1."""
    target_bytes = 8 << 20
    bb = max(1, target_bytes // max(1, bytes_per_batch))
    if batch > 1:
        bb = min(bb, (batch + 1) // 2)   # keep grid_b >= 2 for v7x megacore
    if bb >= batch:
        return batch                     # block equals full dim -> always legal
    bb = (bb // 8) * 8                   # sublane (8) alignment for partial blocks
    return batch if bb == 0 else bb


def sensor_action1(inputs, weight, bias, *, block_b=None):
    """inputs: (B, L, D); weight: (D, A); bias: (A,). Returns (B, S+1, A)."""
    B, L, D = inputs.shape
    A = weight.shape[1]
    S = SENSOR_NUM
    assert L >= S, "max_len must be >= sensor_num"

    # Lane-dense views: input (B, L*D), output (B, (S+1)*A).  Both reshapes are
    # contiguous and free.
    x2d = inputs.reshape(B, L * D)
    w_full, b_full = _build_fused_weight(weight, bias, L, S)

    if block_b is None:
        block_b = _pick_block_b(B, L * D * inputs.dtype.itemsize)
    grid_b = pl.cdiv(B, block_b)

    out2d = pl.pallas_call(
        _sensor_action1_kernel,
        out_shape=jax.ShapeDtypeStruct((B, (S + 1) * A), inputs.dtype),
        grid_spec=pltpu.PrefetchScalarGridSpec(
            num_scalar_prefetch=0,
            grid=(grid_b,),
            in_specs=[
                pl.BlockSpec((block_b, L * D), lambda b: (b, 0)),
                pl.BlockSpec((L * D, (S + 1) * A), lambda b: (0, 0)),  # resident
                pl.BlockSpec((1, (S + 1) * A), lambda b: (0, 0)),      # resident
            ],
            out_specs=pl.BlockSpec((block_b, (S + 1) * A), lambda b: (b, 0)),
        ),
        compiler_params=pltpu.CompilerParams(
            dimension_semantics=("parallel",),       # megacore-shardable batch axis
            vmem_limit_bytes=48 * 1024 * 1024,       # safe under v7x's 64 MiB VMEM
        ),
    )(x2d, w_full, b_full)

    return out2d.reshape(B, S + 1, A)


def _reference(inputs, weight, bias):
    L = inputs.shape[1]
    pos = jnp.sum(inputs, axis=1, keepdims=True) / L
    head = inputs[:, :SENSOR_NUM, :]
    cat = jnp.concatenate([head, pos], axis=1)
    return cat @ weight + bias


if __name__ == "__main__":
    # Small shapes consistent with the module: batch=2, max_len=8, model_dim=32.
    B, L, D = 2, 8, 32

    key = jax.random.PRNGKey(0)
    k_x, k_w, k_b = jax.random.split(key, 3)
    x = jax.random.normal(k_x, (B, L, D), dtype=jnp.float32)
    # nn.Linear(D, A) weights stored transposed as (D, A) for the kernel.
    w = jax.random.normal(k_w, (D, ACTION_DIM), dtype=jnp.float32) * 0.1
    b = jax.random.normal(k_b, (ACTION_DIM,), dtype=jnp.float32) * 0.1

    out = jax.block_until_ready(sensor_action1(x, w, b))

    ref = _reference(x, w, b)
    assert out.shape == (B, SENSOR_NUM + 1, ACTION_DIM)
    # Pooled row is computed as sum_l x_l @ (W/L) inside one fused matmul:
    # mathematically identical to (mean x) @ W, only FP summation order differs.
    assert jnp.allclose(out, ref, atol=2e-5, rtol=1e-5)

    print("KERNEL_OK")
</pallas_src>

<mosaic_0001>
module attributes {stable_mosaic.version = 11 : i64} {
  func.func @_sensor_action1_kernel(%arg0: i32, %arg1: memref<2x256xf32, #tpu.memory_space<vmem>>, %arg2: memref<256x56xf32, #tpu.memory_space<vmem>>, %arg3: memref<1x56xf32, #tpu.memory_space<vmem>>, %arg4: memref<2x56xf32, #tpu.memory_space<vmem>>) attributes {dimension_semantics = [#tpu.dimension_semantics<parallel>], iteration_bounds = array<i64: 1>, scalar_prefetch = 0 : i64, scratch_operands = 0 : i64, tpu.core_type = #tpu.core_type<tc>, window_params = [{transform_indices = @transform_0, window_bounds = array<i64: 2, 256>}, {pipeline_mode = #tpu.pipeline_mode<synchronous>, transform_indices = @transform_1, window_bounds = array<i64: 256, 56>}, {pipeline_mode = #tpu.pipeline_mode<synchronous>, transform_indices = @transform_2, window_bounds = array<i64: 1, 56>}, {transform_indices = @transform_3, window_bounds = array<i64: 2, 56>}]} {
    %c0 = arith.constant 0 : index
    %c0_0 = arith.constant 0 : index
    %0 = vector.load %arg1[%c0, %c0_0] : memref<2x256xf32, #tpu.memory_space<vmem>>, vector<2x256xf32>
    %c0_1 = arith.constant 0 : index
    %c0_2 = arith.constant 0 : index
    %1 = vector.load %arg2[%c0_1, %c0_2] : memref<256x56xf32, #tpu.memory_space<vmem>>, vector<256x56xf32>
    %cst = arith.constant dense<0.000000e+00> : vector<2x56xf32>
    %2 = tpu.matmul %0, %1, %cst {dimension_numbers = #tpu.dot_dimension_numbers<[1], [0], [0], [1], [0, 0, 1, 1], [], []>} : vector<2x256xf32>, vector<256x56xf32>, vector<2x56xf32> -> vector<2x56xf32>
    %c0_3 = arith.constant 0 : index
    %c0_4 = arith.constant 0 : index
    %3 = vector.load %arg3[%c0_3, %c0_4] : memref<1x56xf32, #tpu.memory_space<vmem>>, vector<1x56xf32>
    %4 = vector.broadcast %3 : vector<1x56xf32> to vector<2x56xf32>
    %5 = arith.addf %2, %4 : vector<2x56xf32>
    %c0_5 = arith.constant 0 : index
    %c0_6 = arith.constant 0 : index
    %6 = vector.load %arg4[%c0_5, %c0_6] : memref<2x56xf32, #tpu.memory_space<vmem>>, vector<2x56xf32>
    tpu.vector_store %arg4[%c0_5, %c0_6], %5 {strides = array<i32>} : memref<2x56xf32, #tpu.memory_space<vmem>>, vector<2x56xf32>,
    return
  }
  func.func @transform_0(%arg0: i32) -> (i32, i32) {
    %c0_i32 = arith.constant 0 : i32
    %c0_i32_0 = arith.constant 0 : i32
    return %arg0, %c0_i32 : i32, i32
  }
  func.func @transform_1(%arg0: i32) -> (i32, i32) {
    %c0_i32 = arith.constant 0 : i32
    %c0_i32_0 = arith.constant 0 : i32
    %c0_i32_1 = arith.constant 0 : i32
    return %c0_i32, %c0_i32_0 : i32, i32
  }
  func.func @transform_2(%arg0: i32) -> (i32, i32) {
    %c0_i32 = arith.constant 0 : i32
    %c0_i32_0 = arith.constant 0 : i32
    %c0_i32_1 = arith.constant 0 : i32
    return %c0_i32, %c0_i32_0 : i32, i32
  }
  func.func @transform_3(%arg0: i32) -> (i32, i32) {
    %c0_i32 = arith.constant 0 : i32
    %c0_i32_0 = arith.constant 0 : i32
    return %arg0, %c0_i32 : i32, i32
  }
}

</mosaic_0001>

<bundles_post_ra>
// kernel: tpu_custom_call.1
= control target key start
LH: loop header
LB: loop body
LE: loop exit
PB: predicated region body
PF: predicated region fallthrough
CT: control target
= control target key end

     0   :  { %s338_s0 = inlined_call_operand.vmem [shape: f32[2,256], index: 0, kind: input, shape index: {}]   ;;  %s339_s1 = inlined_call_operand.vmem [shape: f32[256,56], index: 1, kind: input, shape index: {}]   ;;  %s340_s2 = inlined_call_operand.vmem [shape: f32[1,56], index: 2, kind: input, shape index: {}]   ;;  %s341_s3 = inlined_call_operand.hbm [shape: f32[2,56], index: 3, kind: output, shape index: {}]  }
   0x1   :  { %v47_v0 = vld [vmem:[%s339_s1 + $0xf8] sm:$0xff]  ;;  %v46_v2 = vld [vmem:[%s339_s1 + $0xf0] sm:$0xff]  ;;  %v45_v4 = vld [vmem:[%s339_s1 + $0xe8] sm:$0xff] }
   0x2   :  { %v31_v1 = vld [vmem:[%s339_s1 + $0x78] sm:$0xff]  ;;  %154 = vmatprep.subr.mxu0 %v47_v0  ;;  %v30_v3 = vld [vmem:[%s339_s1 + $0x70] sm:$0xff]  ;;  %v29_v5 = vld [vmem:[%s339_s1 + $0x68] sm:$0xff] }
   0x3   :  { %155 = vmatpush3.msra.mxu0 %v31_v1  ;;  %v44_v6 = vld [vmem:[%s339_s1 + $0xe0] sm:$0xff]  ;;  %v43_v8 = vld [vmem:[%s339_s1 + $0xd8] sm:$0xff]  ;;  %v42_v10 = vld [vmem:[%s339_s1 + $0xd0] sm:$0xff] }
   0x4   :  { %156 = vmatprep.subr.mxu0 %v46_v2  ;;  %v28_v7 = vld [vmem:[%s339_s1 + $0x60] sm:$0xff]  ;;  %v27_v9 = vld [vmem:[%s339_s1 + $0x58] sm:$0xff]  ;;  %v26_v11 = vld [vmem:[%s339_s1 + $0x50] sm:$0xff] }
   0x5   :  { %157 = vmatpush3.msra.mxu0 %v30_v3  ;;  %v41_v12 = vld [vmem:[%s339_s1 + $0xc8] sm:$0xff]  ;;  %v153_v13 = vld.sshfl [vmem:[%s338_s0] sm:$0x33 pattern:$0x76325410] }
   0x6   :  { %158 = vmatprep.subr.mxu0 %v45_v4  ;;  %v25_v14 = vld [vmem:[%s339_s1 + $0x48] sm:$0xff]  ;;  %v63_v15 = vcombine.high %v153_v13, %v153_v13 }
   0x7   :  { %159 = vmatpush3.msra.mxu0 %v29_v5 }
   0x8   :  { %160 = vmatprep.subr.mxu0 %v44_v6 }
   0x9   :  { %161 = vmatpush3.msra.mxu0 %v28_v7 }
   0xa   :  { %162 = vmatprep.subr.mxu0 %v43_v8 }
   0xb   :  { %163 = vmatpush3.msra.mxu0 %v27_v9 }
   0xc   :  { %164 = vmatprep.subr.mxu0 %v42_v10 }
   0xd   :  { %8 = vsyncpa [#allocation3], 0  ;;  %165 = vmatpush3.msra.mxu0 %v26_v11  ;;  %v40_v16 = vld [vmem:[%s339_s1 + $0xc0] sm:$0xff]  ;;  %130 = vmatprep.mubr.f32.mxu0 %v63_v15  ;;  %v39_v18 = vld [vmem:[%s339_s1 + $0xb8] sm:$0xff]  ;;  %s212_s24 = smov [#allocation2]   ;;  %vm136_vm0 = vcmask 451584  }
   0xe   :  { %166 = vmatprep.subr.mxu0 %v41_v12  ;;  %v24_v17 = vld [vmem:[%s339_s1 + $0x40] sm:$0xff]  ;;  %v23_v19 = vld [vmem:[%s339_s1 + $0x38] sm:$0xff]  ;;  %v38_v20 = vld [vmem:[%s339_s1 + $0xb0] sm:$0xff]  ;;  %s144_s25 = sshll.u32 %s212_s24, 4  ;;  %s145_s25 = int_to_ptr.vmem [resolvable:$true] %s144_s25 }
   0xf   :  { %167 = vmatpush3.msra.mxu0 %v25_v14  ;;  %v22_v21 = vld [vmem:[%s339_s1 + $0x30] sm:$0xff]  ;;  %v37_v22 = vld [vmem:[%s339_s1 + $0xa8] sm:$0xff]  ;;  %v36_v24 = vld [vmem:[%s339_s1 + $0xa0] sm:$0xff]  ;;  %s190_s26 = scalar_lea.vmem %s145_s25, 32  ;;  %p195_p1 = scmp.lt.s32.totalorder %s145_s25, %s145_s25 }
  0x10   :  { %168 = vmatprep.subr.mxu0 %v40_v16  ;;  %v21_v23 = vld [vmem:[%s339_s1 + $0x28] sm:$0xff]  ;;  %v20_v25 = vld [vmem:[%s339_s1 + $0x20] sm:$0xff]  ;;  %v35_v26 = vld [vmem:[%s339_s1 + $0x98] sm:$0xff]  ;;  %p191_p0 = scmp.ne.s32.totalorder %s145_s25, %s190_s26  ;;  %p196_p2 = scmp.lt.s32.totalorder %s190_s26, %s190_s26 }
  0x11   :  { %169 = vmatpush3.msra.mxu0 %v24_v17  ;;  %v19_v27 = vld [vmem:[%s339_s1 + $0x18] sm:$0xff]  ;;  %v34_v28 = vld [vmem:[%s339_s1 + $0x90] sm:$0xff]  ;;  %v33_v30 = vld [vmem:[%s339_s1 + $0x88] sm:$0xff] }
  0x12   :  { %170 = vmatprep.subr.mxu0 %v39_v18  ;;  %v18_v29 = vld [vmem:[%s339_s1 + $0x10] sm:$0xff]  ;;  %v17_v31 = vld [vmem:[%s339_s1 + $0x8] sm:$0xff]  ;;  %v32_v32 = vld [vmem:[%s339_s1 + $0x80] sm:$0xff]  ;;  %p197_p3 = por %p196_p2, %p195_p1 }
  0x13   :  { %171 = vmatpush3.msra.mxu0 %v23_v19  ;;  %v16_v33 = vld [vmem:[%s339_s1] sm:$0xff] }
  0x14   :  { %172 = vmatprep.subr.mxu0 %v38_v20  ;;  %v152_v35 = vld [vmem:[%s340_s2] ss:$0 sm:$0xff]  ;;  %p198_p4 = pnand %p197_p3, %p191_p0 }
  0x15   :  { %173 = vmatpush3.msra.mxu0 %v22_v21 }
  0x16   :  { %174 = vmatprep.subr.mxu0 %v37_v22 }
  0x17   :  { %175 = vmatpush3.msra.mxu0 %v21_v23 }
  0x18   :  { %176 = vmatprep.subr.mxu0 %v36_v24 }
  0x19   :  { %177 = vmatpush3.msra.mxu0 %v20_v25 }
  0x1a   :  { %178 = vmatprep.subr.mxu0 %v35_v26 }
  0x1b   :  { %179 = vmatpush3.msra.mxu0 %v19_v27 }
  0x1c   :  { %180 = vmatprep.subr.mxu0 %v34_v28 }
  0x1d   :  { %181 = vmatpush3.msra.mxu0 %v18_v29 }
  0x1e   :  { %182 = vmatprep.subr.mxu0 %v33_v30 }
  0x1f   :  { %183 = vmatpush3.msra.mxu0 %v17_v31 }
  0x20   :  { %184 = vmatprep.subr.mxu0 %v32_v32 }
  0x21   :  { %185 = vmatpush3.msra.mxu0 %v16_v33 }
  0x22   :  { %131 = vmatmul.mubr.f32.vlgmr.msra.gmra.mxu0 %v153_v13 }
  0xe2   :  { %v186_v34 = vpop.f32.mrf.mxu0 }
  0xe4   :  { %v187_v36 = vpop.f32.mrf.mxu0 }
  0xe5   :  { %v188_v37 = vadd.f32 %v187_v36, %v186_v34 }
  0xe7   :  { %v133_v38 = vadd.f32 %v188_v37, %v152_v35 }
  0xe9   :  { %137 = vst.msk [vmem:[#allocation2] sm:$0x3] %vm136_vm0, %v133_v38 }
  0xea   :  { %201 = shalt.err (!%p198_p4)
}
  0xeb   :  { %147 = dma.vmem_to_hbm [thread:$0]  %s145_s25, 32, %s341_s3, [#allocation3]  }
  0xec   :  { %210 = dma.done.wait [#allocation3], 32  }
  0xed   :  { %211 = vsyncadd [#allocation3], 4294967264 }
  0xee   :  { %151 = vsyncpa [#allocation3], 1 }

</bundles_post_ra>
